<compile_context>
chip_gen: v6e
topology: v6e:2x2x1
jax: 0.10.0
libtpu: 0.0.40
codegen_flags: <defaults>
</compile_context>

<pallas_src>
import functools

import jax
import jax.numpy as jnp
from jax.experimental import pallas as pl
from jax.experimental.pallas import tpu as pltpu

LANE = 128
MAX_BLOCK_B = 512          # rows per grid step at large batch (multiple of 128)
VMEM_LIMIT_BYTES = 48 * 1024 * 1024   # safe on v5e/v6e/v7x (v7x physical = 64 MiB)


# ----------------------------- Pallas kernel ------------------------------ #
def _judgment_kernel(sit_ref, rot_ref, wtop_ref, wbot_ref, bpre_ref,
                     wcls_ref, bcls_ref, pred_ref):
    # pre_classifier on the split concat:  h = [sit | rot] @ wpre + bpre
    h = (jnp.dot(sit_ref[...], wtop_ref[...], preferred_element_type=jnp.float32)
         + jnp.dot(rot_ref[...], wbot_ref[...], preferred_element_type=jnp.float32)
         + bpre_ref[...])

    # classifier, padded to a lane-dense multiple of 128 output columns;
    # padded bias = -1e30 -> exp underflows to exactly 0.
    cls = jnp.dot(h, wcls_ref[...], preferred_element_type=jnp.float32) + bcls_ref[...]

    # softmax over the (padded) class axis — exact w.r.t. the true classes.
    m = jnp.max(cls, axis=-1, keepdims=True)
    e = jnp.exp(cls - m)
    denom = jnp.sum(e, axis=-1, keepdims=True)
    pred_ref[...] = e * pl.reciprocal(denom)   # exact reciprocal (1e-5 tolerance)


# ------------------------- one-time parameter prep ------------------------- #
def prepare_params(params):
    """Done ONCE, reused across forward calls (hoisted out of the hot path)."""
    wpre = params["wpre"]          # (2D, D)
    D = wpre.shape[-1]
    C = params["bcls"].shape[-1]
    c_pad = max(LANE, ((C + LANE - 1) // LANE) * LANE)   # round up to 128-multiple

    prepped = {
        "wpre_top": wpre[:D, :],                         # (D, D) — situation half
        "wpre_bot": wpre[D:, :],                         # (D, D) — rot half
        "bpre": params["bpre"].reshape(1, D),
        "wcls_pad": jnp.zeros((D, c_pad), jnp.float32).at[:, :C].set(params["wcls"]),
        "bcls_pad": jnp.full((1, c_pad), -1e30, jnp.float32).at[:, :C].set(
            params["bcls"].reshape(1, C)),
        "n_classes": C,
        "c_pad": c_pad,
        "d_model": D,
    }
    return prepped


# ------------------------------ Python wrapper ----------------------------- #
def judgment_forward(situation, rot, prepped, *, block_b=MAX_BLOCK_B):
    """situation, rot: (B, D) float32 -> pred (B, n_classes) float32."""
    B, D = situation.shape
    C = prepped["n_classes"]
    c_pad = prepped["c_pad"]

    block_b = min(block_b, B)
    grid = (pl.cdiv(B, block_b),)

    # Activations / output tiled along batch; weights map to the same (0, 0)
    # block every step so they are loaded once and stay VMEM-resident.
    act_spec = pl.BlockSpec((block_b, D), lambda i: (i, 0))
    out_spec = pl.BlockSpec((block_b, c_pad), lambda i: (i, 0))
    wpre_spec = pl.BlockSpec((D, D), lambda i: (0, 0))
    bpre_spec = pl.BlockSpec((1, D), lambda i: (0, 0))
    wcls_spec = pl.BlockSpec((D, c_pad), lambda i: (0, 0))
    bcls_spec = pl.BlockSpec((1, c_pad), lambda i: (0, 0))

    pred_pad = pl.pallas_call(
        _judgment_kernel,
        out_shape=jax.ShapeDtypeStruct((B, c_pad), jnp.float32),
        grid=grid,
        in_specs=[act_spec, act_spec,
                  wpre_spec, wpre_spec, bpre_spec,
                  wcls_spec, bcls_spec],
        out_specs=out_spec,
        compiler_params=pltpu.CompilerParams(
            dimension_semantics=("parallel",),        # megacore on v7x
            vmem_limit_bytes=VMEM_LIMIT_BYTES,
        ),
    )(situation, rot,
      prepped["wpre_top"], prepped["wpre_bot"], prepped["bpre"],
      prepped["wcls_pad"], prepped["bcls_pad"])

    return pred_pad[:, :C]


# --------------------------- pure-JAX reference ---------------------------- #
def reference_forward(situation, rot, params):
    cat = jnp.concatenate([situation, rot], axis=-1)
    logits = cat @ params["wpre"] + params["bpre"]
    cls = logits @ params["wcls"] + params["bcls"]
    return jax.nn.softmax(cls, axis=-1)


# ----------------------------------- main ---------------------------------- #
if __name__ == "__main__":
    B = 2      # nbatches
    D = 48     # d_model (real DistilBERT uses 768; kept small for the demo)
    C = 2      # n_classes

    key = jax.random.PRNGKey(0)
    keys = jax.random.split(key, 8)

    def w(k, shape, scale=0.05):
        return (scale * jax.random.normal(k, shape)).astype(jnp.float32)

    # linear weights stored as (in_features, out_features): y = x @ W + b
    params = {
        "wpre": w(keys[0], (2 * D, D)), "bpre": w(keys[1], (1, D)),
        "wcls": w(keys[2], (D, C)),     "bcls": w(keys[3], (1, C)),
    }

    # TODO(synk): encoder outputs modelled as random (B, D) encodings here.
    situation = jax.random.normal(keys[4], (B, D), dtype=jnp.float32)
    rot = jax.random.normal(keys[5], (B, D), dtype=jnp.float32)

    # One-time parameter preparation (padding / weight split hoisted here).
    prepped = jax.tree_util.tree_map(
        lambda x: jax.block_until_ready(x) if isinstance(x, jax.Array) else x,
        prepare_params(params))

    pred = judgment_forward(situation, rot, prepped)
    pred = jax.block_until_ready(pred)

    ref = reference_forward(situation, rot, params)
    assert pred.shape == (B, C)
    assert jnp.allclose(pred, ref, atol=1e-5, rtol=1e-5), (pred, ref)
    assert jnp.allclose(pred.sum(axis=-1), 1.0, atol=1e-5)

    print("KERNEL_OK")
</pallas_src>

<mosaic_0001>
module attributes {stable_mosaic.version = 11 : i64} {
  func.func @_judgment_kernel(%arg0: i32, %arg1: memref<2x48xf32, #tpu.memory_space<vmem>>, %arg2: memref<2x48xf32, #tpu.memory_space<vmem>>, %arg3: memref<48x48xf32, #tpu.memory_space<vmem>>, %arg4: memref<48x48xf32, #tpu.memory_space<vmem>>, %arg5: memref<1x48xf32, #tpu.memory_space<vmem>>, %arg6: memref<48x128xf32, #tpu.memory_space<vmem>>, %arg7: memref<1x128xf32, #tpu.memory_space<vmem>>, %arg8: memref<2x128xf32, #tpu.memory_space<vmem>>) attributes {dimension_semantics = [#tpu.dimension_semantics<parallel>], iteration_bounds = array<i64: 1>, scalar_prefetch = 0 : i64, scratch_operands = 0 : i64, tpu.core_type = #tpu.core_type<tc>, window_params = [{transform_indices = @transform_0, window_bounds = array<i64: 2, 48>}, {transform_indices = @transform_1, window_bounds = array<i64: 2, 48>}, {pipeline_mode = #tpu.pipeline_mode<synchronous>, transform_indices = @transform_2, window_bounds = array<i64: 48, 48>}, {pipeline_mode = #tpu.pipeline_mode<synchronous>, transform_indices = @transform_3, window_bounds = array<i64: 48, 48>}, {pipeline_mode = #tpu.pipeline_mode<synchronous>, transform_indices = @transform_4, window_bounds = array<i64: 1, 48>}, {pipeline_mode = #tpu.pipeline_mode<synchronous>, transform_indices = @transform_5, window_bounds = array<i64: 48, 128>}, {pipeline_mode = #tpu.pipeline_mode<synchronous>, transform_indices = @transform_6, window_bounds = array<i64: 1, 128>}, {transform_indices = @transform_7, window_bounds = array<i64: 2, 128>}]} {
    %c0 = arith.constant 0 : index
    %c0_0 = arith.constant 0 : index
    %0 = vector.load %arg1[%c0, %c0_0] : memref<2x48xf32, #tpu.memory_space<vmem>>, vector<2x48xf32>
    %c0_1 = arith.constant 0 : index
    %c0_2 = arith.constant 0 : index
    %1 = vector.load %arg3[%c0_1, %c0_2] : memref<48x48xf32, #tpu.memory_space<vmem>>, vector<48x48xf32>
    %cst = arith.constant dense<0.000000e+00> : vector<2x48xf32>
    %2 = tpu.matmul %0, %1, %cst {dimension_numbers = #tpu.dot_dimension_numbers<[1], [0], [0], [1], [0, 0, 1, 1], [], []>} : vector<2x48xf32>, vector<48x48xf32>, vector<2x48xf32> -> vector<2x48xf32>
    %c0_3 = arith.constant 0 : index
    %c0_4 = arith.constant 0 : index
    %3 = vector.load %arg2[%c0_3, %c0_4] : memref<2x48xf32, #tpu.memory_space<vmem>>, vector<2x48xf32>
    %c0_5 = arith.constant 0 : index
    %c0_6 = arith.constant 0 : index
    %4 = vector.load %arg4[%c0_5, %c0_6] : memref<48x48xf32, #tpu.memory_space<vmem>>, vector<48x48xf32>
    %cst_7 = arith.constant dense<0.000000e+00> : vector<2x48xf32>
    %5 = tpu.matmul %3, %4, %cst_7 {dimension_numbers = #tpu.dot_dimension_numbers<[1], [0], [0], [1], [0, 0, 1, 1], [], []>} : vector<2x48xf32>, vector<48x48xf32>, vector<2x48xf32> -> vector<2x48xf32>
    %6 = arith.addf %2, %5 : vector<2x48xf32>
    %c0_8 = arith.constant 0 : index
    %c0_9 = arith.constant 0 : index
    %7 = vector.load %arg5[%c0_8, %c0_9] : memref<1x48xf32, #tpu.memory_space<vmem>>, vector<1x48xf32>
    %8 = vector.broadcast %7 : vector<1x48xf32> to vector<2x48xf32>
    %9 = arith.addf %6, %8 : vector<2x48xf32>
    %c0_10 = arith.constant 0 : index
    %c0_11 = arith.constant 0 : index
    %10 = vector.load %arg6[%c0_10, %c0_11] : memref<48x128xf32, #tpu.memory_space<vmem>>, vector<48x128xf32>
    %cst_12 = arith.constant dense<0.000000e+00> : vector<2x128xf32>
    %11 = tpu.matmul %9, %10, %cst_12 {dimension_numbers = #tpu.dot_dimension_numbers<[1], [0], [0], [1], [0, 0, 1, 1], [], []>} : vector<2x48xf32>, vector<48x128xf32>, vector<2x128xf32> -> vector<2x128xf32>
    %c0_13 = arith.constant 0 : index
    %c0_14 = arith.constant 0 : index
    %12 = vector.load %arg7[%c0_13, %c0_14] : memref<1x128xf32, #tpu.memory_space<vmem>>, vector<1x128xf32>
    %13 = vector.broadcast %12 : vector<1x128xf32> to vector<2x128xf32>
    %14 = arith.addf %11, %13 : vector<2x128xf32>
    %cst_15 = arith.constant dense<0xFF800000> : vector<2xf32>
    %15 = vector.multi_reduction <maximumf>, %14, %cst_15 [1] : vector<2x128xf32> to vector<2xf32>
    %16 = vector.shape_cast %15 : vector<2xf32> to vector<2x1xf32>
    %17 = vector.broadcast %16 : vector<2x1xf32> to vector<2x128xf32>
    %18 = arith.subf %14, %17 : vector<2x128xf32>
    %19 = math.exp %18 : vector<2x128xf32>
    %cst_16 = arith.constant dense<0.000000e+00> : vector<2xf32>
    %20 = vector.multi_reduction <add>, %19, %cst_16 [1] : vector<2x128xf32> to vector<2xf32>
    %21 = vector.shape_cast %20 : vector<2xf32> to vector<2x1xf32>
    %22 = tpu.reciprocal %21 : vector<2x1xf32> -> vector<2x1xf32>
    %23 = vector.broadcast %22 : vector<2x1xf32> to vector<2x128xf32>
    %24 = arith.mulf %19, %23 : vector<2x128xf32>
    %c0_17 = arith.constant 0 : index
    %c0_18 = arith.constant 0 : index
    %25 = vector.load %arg8[%c0_17, %c0_18] : memref<2x128xf32, #tpu.memory_space<vmem>>, vector<2x128xf32>
    tpu.vector_store %arg8[%c0_17, %c0_18], %24 {strides = array<i32>} : memref<2x128xf32, #tpu.memory_space<vmem>>, vector<2x128xf32>,
    return
  }
  func.func @transform_0(%arg0: i32) -> (i32, i32) {
    %c0_i32 = arith.constant 0 : i32
    %c0_i32_0 = arith.constant 0 : i32
    return %arg0, %c0_i32 : i32, i32
  }
  func.func @transform_1(%arg0: i32) -> (i32, i32) {
    %c0_i32 = arith.constant 0 : i32
    %c0_i32_0 = arith.constant 0 : i32
    return %arg0, %c0_i32 : i32, i32
  }
  func.func @transform_2(%arg0: i32) -> (i32, i32) {
    %c0_i32 = arith.constant 0 : i32
    %c0_i32_0 = arith.constant 0 : i32
    %c0_i32_1 = arith.constant 0 : i32
    return %c0_i32, %c0_i32_0 : i32, i32
  }
  func.func @transform_3(%arg0: i32) -> (i32, i32) {
    %c0_i32 = arith.constant 0 : i32
    %c0_i32_0 = arith.constant 0 : i32
    %c0_i32_1 = arith.constant 0 : i32
    return %c0_i32, %c0_i32_0 : i32, i32
  }
  func.func @transform_4(%arg0: i32) -> (i32, i32) {
    %c0_i32 = arith.constant 0 : i32
    %c0_i32_0 = arith.constant 0 : i32
    %c0_i32_1 = arith.constant 0 : i32
    return %c0_i32, %c0_i32_0 : i32, i32
  }
  func.func @transform_5(%arg0: i32) -> (i32, i32) {
    %c0_i32 = arith.constant 0 : i32
    %c0_i32_0 = arith.constant 0 : i32
    %c0_i32_1 = arith.constant 0 : i32
    return %c0_i32, %c0_i32_0 : i32, i32
  }
  func.func @transform_6(%arg0: i32) -> (i32, i32) {
    %c0_i32 = arith.constant 0 : i32
    %c0_i32_0 = arith.constant 0 : i32
    %c0_i32_1 = arith.constant 0 : i32
    return %c0_i32, %c0_i32_0 : i32, i32
  }
  func.func @transform_7(%arg0: i32) -> (i32, i32) {
    %c0_i32 = arith.constant 0 : i32
    %c0_i32_0 = arith.constant 0 : i32
    return %arg0, %c0_i32 : i32, i32
  }
}

</mosaic_0001>

<bundles_post_ra>
// kernel: tpu_custom_call.1
= control target key start
LH: loop header
LB: loop body
LE: loop exit
PB: predicated region body
PF: predicated region fallthrough
CT: control target
= control target key end

     0   :  { %12 = vsyncpa [#allocation3], 0  ;;  %s678_s0 = inlined_call_operand.hbm [shape: f32[2,48], index: 0, kind: input, shape index: {}]   ;;  %s679_s1 = inlined_call_operand.hbm [shape: f32[2,48], index: 1, kind: input, shape index: {}]   ;;  %s680_s2 = inlined_call_operand.hbm [shape: f32[48,48], index: 2, kind: input, shape index: {}]   ;;  %s681_s3 = inlined_call_operand.hbm [shape: f32[48,48], index: 3, kind: input, shape index: {}]   ;;  %s682_s4 = inlined_call_operand.vmem [shape: f32[1,48], index: 4, kind: input, shape index: {}]   ;;  %s683_s5 = inlined_call_operand.hbm [shape: f32[48,128], index: 5, kind: input, shape index: {}]   ;;  %s684_s6 = inlined_call_operand.vmem [shape: f32[1,128], index: 6, kind: input, shape index: {}]   ;;  %s685_s7 = inlined_call_operand.hbm [shape: f32[2,128], index: 7, kind: output, shape index: {}]  }
   0x1   :  { %13 = vsyncpa [#allocation6], 0 }
   0x2   :  { %14 = vsyncpa [#allocation9], 0 }
   0x3   :  { %15 = vsyncpa [#allocation4], 0  ;;  %s589_s24 = smov [#allocation5]  }
   0x4   :  { %s32_s25 = sshll.u32 %s589_s24, 4  ;;  %s33_s25 = int_to_ptr.vmem [resolvable:$true] %s32_s25 }
   0x5   :  { %s469_s26 = scalar_lea.vmem %s33_s25, 32  ;;  %p474_p1 = scmp.lt.s32.totalorder %s33_s25, %s33_s25 }
   0x6   :  { %p470_p0 = scmp.ne.s32.totalorder %s33_s25, %s469_s26  ;;  %p475_p2 = scmp.lt.s32.totalorder %s469_s26, %s469_s26 }
   0x8   :  { %p476_p3 = por %p475_p2, %p474_p1 }
   0xa   :  { %p477_p4 = pnand %p476_p3, %p470_p0 }
   0xc   :  { %480 = shalt.err (!%p477_p4)
}
   0xd   :  { %35 = dma.hbm_to_vmem [thread:$0]  %s679_s1, 32, %s33_s25, [#allocation6]  }
   0xe   :  { %s590_s29 = smov [#allocation8]   ;;  %s591_s8 = smov [#allocation2]  }
   0xf   :  { %s53_s30 = sshll.u32 %s590_s29, 4  ;;  %s22_s9 = sshll.u32 %s591_s8, 4  ;;  %s54_s30 = int_to_ptr.vmem [resolvable:$true] %s53_s30  ;;  %s23_s9 = int_to_ptr.vmem [resolvable:$true] %s22_s9 }
  0x10   :  { %s489_s10 = scalar_lea.vmem %s54_s30, 768  ;;  %p494_p6 = scmp.lt.s32.totalorder %s54_s30, %s54_s30 }
  0x11   :  { %p490_p5 = scmp.ne.s32.totalorder %s54_s30, %s489_s10  ;;  %p495_p7 = scmp.lt.s32.totalorder %s489_s10, %s489_s10 }
  0x13   :  { %p496_p8 = por %p495_p7, %p494_p6 }
  0x15   :  { %p497_p9 = pnand %p496_p8, %p490_p5 }
  0x17   :  { %500 = shalt.err (!%p497_p9)
}
  0x18   :  { %s592_s11 = smov 128   ;;  %s593_s12 = smov 8  }
  0x19   :  { %59 = dma.hbm_to_vmem [thread:$0]  %s681_s3, 768, %s54_s30, [#allocation9], %s592_s11, %s592_s11, %s593_s12  }
  0x1a   :  { %s509_s1 = scalar_lea.vmem %s23_s9, 32  ;;  %p514_p11 = scmp.lt.s32.totalorder %s23_s9, %s23_s9 }
  0x1b   :  { %p510_p10 = scmp.ne.s32.totalorder %s23_s9, %s509_s1  ;;  %p515_p12 = scmp.lt.s32.totalorder %s509_s1, %s509_s1 }
  0x1d   :  { %p516_p13 = por %p515_p12, %p514_p11 }
  0x1f   :  { %p517_p0 = pnand %p516_p13, %p510_p10 }
  0x21   :  { %520 = shalt.err (!%p517_p0)
}
  0x22   :  { %25 = dma.hbm_to_vmem [thread:$0]  %s678_s0, 32, %s23_s9, [#allocation3]  }
  0x23   :  { %s594_s17 = smov [#allocation7]   ;;  %s595_s19 = smov [#allocation10]  }
  0x24   :  { %s41_s18 = sshll.u32 %s594_s17, 4  ;;  %s67_s20 = sshll.u32 %s595_s19, 4  ;;  %s42_s18 = int_to_ptr.vmem [resolvable:$true] %s41_s18  ;;  %s68_s20 = int_to_ptr.vmem [resolvable:$true] %s67_s20 }
  0x25   :  { %s529_s21 = scalar_lea.vmem %s42_s18, 768  ;;  %p534_p2 = scmp.lt.s32.totalorder %s42_s18, %s42_s18 }
  0x26   :  { %p530_p1 = scmp.ne.s32.totalorder %s42_s18, %s529_s21  ;;  %p535_p3 = scmp.lt.s32.totalorder %s529_s21, %s529_s21 }
  0x28   :  { %p536_p4 = por %p535_p3, %p534_p2 }
  0x2a   :  { %p537_p5 = pnand %p536_p4, %p530_p1 }
  0x2c   :  { %540 = shalt.err (!%p537_p5)
}
  0x2d   :  { %47 = dma.hbm_to_vmem [thread:$0]  %s680_s2, 768, %s42_s18, [#allocation6], %s592_s11, %s592_s11, %s593_s12  }
  0x2e   :  { %s549_s0 = scalar_lea.vmem %s68_s20, 768  ;;  %p554_p7 = scmp.lt.s32.totalorder %s68_s20, %s68_s20 }
  0x2f   :  { %p550_p6 = scmp.ne.s32.totalorder %s68_s20, %s549_s0  ;;  %p555_p8 = scmp.lt.s32.totalorder %s549_s0, %s549_s0 }
  0x31   :  { %p556_p9 = por %p555_p8, %p554_p7 }
  0x33   :  { %p557_p10 = pnand %p556_p9, %p550_p6 }
  0x35   :  { %560 = shalt.err (!%p557_p10)
}
  0x36   :  { %73 = dma.hbm_to_vmem [thread:$0]  %s683_s5, 768, %s68_s20, [#allocation9], %s592_s11, %s592_s11, %s593_s12  }
  0x37   :  { %581 = dma.done.wait [#allocation3], 32  }
  0x38   :  { %582 = vsyncadd [#allocation3], 4294967264 }
  0x39   :  { %583 = dma.done.wait [#allocation6], 800  }
  0x3a   :  { %584 = vsyncadd [#allocation6], 4294966496 }
  0x3b   :  { %585 = dma.done.wait [#allocation9], 1536  }
  0x3c   :  { %586 = vsyncadd [#allocation9], 4294965760  ;;  %v596_v0 = vmov 0.0   ;;  %vm597_vm0 = vmmov 0   ;;  %v104_v1 = vld [vmem:[#allocation8 + $0x28] sm:$0xff]  ;;  %v97_v2 = vld [vmem:[#allocation7 + $0x28] sm:$0xff] }
  0x3d   :  { %402 = vmatprep.subr.mxu0 %v596_v0  ;;  %417 = vmatprep.subr.mxu1 %v596_v0  ;;  %v103_v3 = vld [vmem:[#allocation8 + $0x20] sm:$0xff]  ;;  %v96_v4 = vld [vmem:[#allocation7 + $0x20] sm:$0xff]  ;;  %v102_v5 = vld [vmem:[#allocation8 + $0x18] sm:$0xff]  ;;  %vm105_vm1 = vcmask 392192   ;;  %vm346_vm2 = vcmask 1041408  }
  0x3e   :  { %414 = vmatprep.mubr.msk.f32.mxu0 %vm597_vm0, %v596_v0  ;;  %429 = vmatprep.mubr.msk.f32.mxu1 %vm597_vm0, %v596_v0  ;;  %v95_v6 = vld [vmem:[#allocation7 + $0x18] sm:$0xff]  ;;  %v101_v7 = vld [vmem:[#allocation8 + $0x10] sm:$0xff]  ;;  %v94_v8 = vld [vmem:[#allocation7 + $0x10] sm:$0xff] }
  0x3f   :  { %403 = vmatpush3.msra.mxu0 %v104_v1  ;;  %418 = vmatpush3.msra.mxu1 %v97_v2  ;;  %v100_v9 = vld [vmem:[#allocation8 + $0x8] sm:$0xff]  ;;  %v93_v10 = vld [vmem:[#allocation7 + $0x8] sm:$0xff]  ;;  %v99_v11 = vld [vmem:[#allocation8] sm:$0xff] }
  0x40   :  { %404 = vmatprep.subr.mxu0 %v596_v0  ;;  %419 = vmatprep.subr.mxu1 %v596_v0  ;;  %v92_v12 = vld [vmem:[#allocation7] sm:$0xff]  ;;  %v98_v13 = vld [vmem:[#allocation5] sm:$0x3]  ;;  %v91_v14 = vld [vmem:[#allocation2] sm:$0x3] }
  0x41   :  { %405 = vmatpush3.msra.mxu0 %v103_v3  ;;  %420 = vmatpush3.msra.mxu1 %v96_v4  ;;  %v265_v15 = vld [vmem:[#allocation10 + $0x28] sm:$0xff]  ;;  %v264_v16 = vld [vmem:[#allocation10 + $0x20] sm:$0xff]  ;;  %v263_v17 = vld [vmem:[#allocation10 + $0x18] sm:$0xff] }
  0x42   :  { %406 = vmatprep.subr.mxu0 %v596_v0  ;;  %421 = vmatprep.subr.mxu1 %v596_v0  ;;  %v262_v18 = vld [vmem:[#allocation10 + $0x10] sm:$0xff]  ;;  %v261_v19 = vld [vmem:[#allocation10 + $0x8] sm:$0xff]  ;;  %v260_v20 = vld [vmem:[#allocation10] sm:$0xff] }
  0x43   :  { %407 = vmatpush3.msra.mxu0 %v102_v5  ;;  %422 = vmatpush3.msra.mxu1 %v95_v6  ;;  %v378_v23 = vld [vmem:[%s682_s4] ss:$0 sm:$0xff]  ;;  %s598_s4 = smov [#allocation11]  }
  0x44   :  { %408 = vmatprep.subr.mxu0 %v596_v0  ;;  %423 = vmatprep.subr.mxu1 %v596_v0  ;;  %v379_v28 = vld [vmem:[%s684_s6] ss:$0 sm:$0xff]  ;;  %s365_s27 = sshll.u32 %s598_s4, 4  ;;  %s366_s27 = int_to_ptr.vmem [resolvable:$true] %s365_s27 }
  0x45   :  { %409 = vmatpush3.msra.mxu0 %v101_v7  ;;  %424 = vmatpush3.msra.mxu1 %v94_v8  ;;  %s561_s6 = scalar_lea.vmem %s366_s27, 32  ;;  %p566_p12 = scmp.lt.s32.totalorder %s366_s27, %s366_s27 }
  0x46   :  { %410 = vmatprep.subr.mxu0 %v596_v0  ;;  %425 = vmatprep.subr.mxu1 %v596_v0  ;;  %p562_p11 = scmp.ne.s32.totalorder %s366_s27, %s561_s6  ;;  %p567_p13 = scmp.lt.s32.totalorder %s561_s6, %s561_s6 }
  0x47   :  { %411 = vmatpush3.msra.mxu0 %v100_v9  ;;  %426 = vmatpush3.msra.mxu1 %v93_v10 }
  0x48   :  { %412 = vmatprep.subr.mxu0 %v596_v0  ;;  %427 = vmatprep.subr.mxu1 %v596_v0  ;;  %p568_p0 = por %p567_p13, %p566_p12 }
  0x49   :  { %413 = vmatpush3.msra.mxu0 %v99_v11  ;;  %428 = vmatpush3.msra.mxu1 %v92_v12 }
  0x4a   :  { %415 = vmatmul.mubr.msk.f32.vlgmr.msra.gmra.mxu0 %vm105_vm1, %v98_v13  ;;  %430 = vmatmul.mubr.msk.f32.vlgmr.msra.gmra.mxu1 %vm105_vm1, %v91_v14  ;;  %p569_p1 = pnand %p568_p0, %p562_p11 }
  0x4b   :  { %432 = vmatprep.subr.mxu0 %v596_v0  ;;  %444 = vmatprep.mubr.msk.f32.mxu0 %vm597_vm0, %v596_v0 }
  0x4c   :  { %433 = vmatpush3.msra.mxu0 %v265_v15 }
  0x4d   :  { %434 = vmatprep.subr.mxu0 %v596_v0 }
  0x4e   :  { %435 = vmatpush3.msra.mxu0 %v264_v16 }
  0x4f   :  { %436 = vmatprep.subr.mxu0 %v596_v0 }
  0x50   :  { %437 = vmatpush3.msra.mxu0 %v263_v17 }
  0x51   :  { %438 = vmatprep.subr.mxu0 %v596_v0 }
  0x52   :  { %439 = vmatpush3.msra.mxu0 %v262_v18 }
  0x53   :  { %440 = vmatprep.subr.mxu0 %v596_v0 }
  0x54   :  { %441 = vmatpush3.msra.mxu0 %v261_v19 }
  0x55   :  { %442 = vmatprep.subr.mxu0 %v596_v0 }
  0x56   :  { %443 = vmatpush3.msra.mxu0 %v260_v20 }
 0x10a   :  { %v175_v21 = vpop.f32.mrf.mxu0  ;;  %v248_v22 = vpop.f32.mrf.mxu1 }
 0x10b   :  { %v249_v24 = vadd.f32 %v248_v22, %v175_v21 }
 0x10c   :  { %v416_v25 = vpop.f32.mrf.mxu0  ;;  %v431_v26 = vpop.f32.mrf.mxu1 }
 0x10d   :  { %v259_v27 = vadd.f32 %v378_v23, %v249_v24 }
 0x10f   :  { %445 = vmatmul.mubr.msk.f32.vlgmr.msra.gmra.mxu0 %vm105_vm1, %v259_v27 }
 0x1cf   :  { %v342_v29 = vpop.f32.mrf.mxu0 }
 0x1d0   :  { %v343_v30 = vadd.f32 %v379_v28, %v342_v29 }
 0x1d1   :  { %v446_v31 = vpop.f32.mrf.mxu0 }
 0x1d2   :  { %v347_v32 = vsel %vm346_vm2, %v343_v30, -inf }
 0x1d3   :  { %348 = vmax.xlane.f32.xlu0 %v347_v32 }
 0x25c   :  { %v349_v33 = vpop.xlane.xlu0 %348 }
 0x25d   :  { %v350_v34 = vsub.f32 %v343_v30, %v349_v33 }
 0x25f   :  { %v351_v35 = vmul.f32 1.442695, %v350_v34 }
 0x261   :  { %457 = vpow2.f32 %v351_v35 }
 0x26e   :  { %v458_v36 = vpop.eup %457 }
 0x26f   :  { %v353_v37 = vsel %vm346_vm2, %v458_v36, 0.0 }
 0x270   :  { %354 = vadd.xlane.f32.xlu0 %v353_v37 }
 0x2f9   :  { %v355_v38 = vpop.xlane.xlu0 %354 }
 0x2fa   :  { %459 = vrcp.f32 %v355_v38 }
 0x307   :  { %v460_v39 = vpop.eup %459 }
 0x308   :  { %v357_v40 = vmul.f32 %v460_v39, %v458_v36 }
 0x30a   :  { %358 = vst [vmem:[#allocation11] sm:$0x3] %v357_v40 }
 0x30b   :  { %572 = shalt.err (!%p569_p1)
}
 0x30c   :  { %368 = dma.vmem_to_hbm [thread:$0]  %s366_s27, 32, %s685_s7, [#allocation4]  }
 0x30d   :  { %587 = dma.done.wait [#allocation4], 32  }
 0x30e   :  { %588 = vsyncadd [#allocation4], 4294967264 }
 0x30f   :  { %372 = vsyncpa [#allocation3], 1 }
 0x310   :  { %373 = vsyncpa [#allocation6], 1 }
 0x311   :  { %374 = vsyncpa [#allocation9], 1 }
 0x312   :  { %375 = vsyncpa [#allocation4], 1 }

</bundles_post_ra>
